<compile_context>
chip_gen: v7x
topology: tpu7x:2x2x1
jax: 0.10.0
libtpu: 0.0.40
codegen_flags: <defaults>
</compile_context>

<pallas_src>
import functools

import jax
import jax.numpy as jnp
from jax.experimental import pallas as pl
from jax.experimental.pallas import tpu as pltpu


# ----------------------------------------------------------------------------
# Generation-aware VMEM sizing.
# ----------------------------------------------------------------------------

def _vmem_budgets():
    """Return (vmem_limit_bytes, pipelined-block budget) sized per TPU generation."""
    try:
        phys = int(pltpu.get_tpu_info().vmem_capacity_bytes)
    except Exception:
        phys = 64 * 1024 * 1024          # conservative fallback (v7x-sized)
    if phys >= 96 * 1024 * 1024:
        # v5e / v6e: 128 MiB physical VMEM per TensorCore.
        return 100 * 1024 * 1024, 56 * 1024 * 1024
    # v7x: 64 MiB physical VMEM per TensorCore -> leave compiler headroom.
    return 52 * 1024 * 1024, 26 * 1024 * 1024


# ----------------------------------------------------------------------------
# Shared channel-MLP helper (tiny: C x Cr, done with VPU broadcast-reduce).
# ----------------------------------------------------------------------------

def _channel_scale(mean_col, w1t_ref, w2_ref):
    """sigmoid(W2 @ relu(W1 @ mean)).

    mean_col: (C, 1) f32.  w1t_ref: (C, Cr) = W1^T.  w2_ref: (C, Cr) = W2.
    Returns the per-channel scale with shape (C, 1), f32.
    """
    w1t = w1t_ref[...].astype(jnp.float32)                 # (C, Cr)
    w2 = w2_ref[...].astype(jnp.float32)                   # (C, Cr)
    h = jnp.sum(w1t * mean_col, axis=0, keepdims=True)     # (1, Cr) == W1 @ mean
    h = jnp.maximum(h, 0.0)                                # ReLU
    z = jnp.sum(w2 * h, axis=1, keepdims=True)             # (C, 1) == W2 @ h
    return 1.0 / (1.0 + jnp.exp(-z))                       # sigmoid


# ----------------- fused single-pass kernel (image fits in VMEM) -----------------

def _ca_fused_kernel(x_ref, w1t_ref, w2_ref, o_ref, *, inv_s):
    x = x_ref[...]                                          # (C, S), input dtype
    # f32-accumulated pool without materializing a full f32 copy of the block.
    mean = jnp.sum(x, axis=-1, keepdims=True, dtype=jnp.float32) * inv_s   # (C, 1)
    scale = _channel_scale(mean, w1t_ref, w2_ref)           # (C, 1) f32
    o_ref[...] = x * scale.astype(x.dtype)                  # (C, S) in input dtype


# ----------------- two-pass spatially-tiled kernels -----------------

def _pool_mlp_kernel(x_ref, w1t_ref, w2_ref, y_ref, acc_ref, *, inv_s):
    t = pl.program_id(1)

    @pl.when(t == 0)
    def _init():
        acc_ref[...] = jnp.zeros_like(acc_ref)

    # f32 accumulation directly from the input-dtype tile.
    acc_ref[...] += jnp.sum(x_ref[...], axis=-1, keepdims=True, dtype=jnp.float32)

    @pl.when(t == pl.num_programs(1) - 1)
    def _finalize():
        mean = acc_ref[...] * inv_s                          # (C, 1)
        y_ref[...] = _channel_scale(mean, w1t_ref, w2_ref)   # (C, 1) f32


def _scale_kernel(x_ref, y_ref, o_ref):
    x = x_ref[...]                                           # (C, ST), input dtype
    # Cast only the tiny per-channel scale; multiply in the input dtype.
    o_ref[...] = x * y_ref[...].astype(x.dtype)


# ----------------- wrapper -----------------

def _pick_spatial_tile(c, s, itemsize, bufs, budget_bytes,
                       max_buf_bytes=4 * 1024 * 1024):
    """Largest lane-dense (x128) divisor of s such that (a) one pipelined buffer
    stays <= max_buf_bytes (HBM roofline saturates at ~1-4 MiB blocks) and (b)
    the full live block set (`bufs` buffers) fits the budget."""
    assert s % 128 == 0
    per_unit = c * itemsize                       # bytes per unit of spatial tile
    cands = [d for d in range(128, s + 1, 128) if s % d == 0]
    fitting = [d for d in cands
               if d * per_unit <= max_buf_bytes and bufs * d * per_unit <= budget_bytes]
    return max(fitting) if fitting else 128


def ca_layer(x, w1, w2, *, allow_fused=True, block_budget_bytes=None,
             vmem_limit_bytes=None):
    """Channel attention: out = x * sigmoid(W2 @ relu(W1 @ mean_hw(x))).

    x: (B, C, H, W); w1: (C//r, C); w2: (C, C//r)  (squeezed 1x1 conv weights).
    """
    B, C, H, W = x.shape
    Cr = w1.shape[0]
    assert w1.shape == (Cr, C) and w2.shape == (C, Cr)
    S = H * W
    itemsize = jnp.dtype(x.dtype).itemsize
    inv_s = 1.0 / float(S)

    auto_limit, auto_budget = _vmem_budgets()
    if vmem_limit_bytes is None:
        vmem_limit_bytes = auto_limit
    if block_budget_bytes is None:
        block_budget_bytes = auto_budget

    xf = x.reshape(B, C, S)       # free reshape -> lane-dense minor dim
    w1t = w1.T                    # (C, Cr); tiny, done once

    def cparams(sem):
        return pltpu.CompilerParams(dimension_semantics=sem,
                                    vmem_limit_bytes=vmem_limit_bytes)

    elemwise_cost = pl.CostEstimate(
        flops=2 * B * C * S + 4 * B * C * Cr,
        transcendentals=B * C,
        bytes_accessed=2 * B * C * S * itemsize + 2 * C * Cr * 4)

    # ---- fast path: one pass per batch image, 1 HBM read + 1 HBM write of x ----
    # No in-kernel f32 upcast of the block, so the live footprint really is
    # 2 double-buffered input blocks + 2 output blocks (+ tiny weights).
    fused_block_bytes = 4 * C * S * itemsize + 2 * C * Cr * 4
    if allow_fused and fused_block_bytes <= block_budget_bytes:
        out = pl.pallas_call(
            functools.partial(_ca_fused_kernel, inv_s=inv_s),
            out_shape=jax.ShapeDtypeStruct((B, C, S), x.dtype),
            grid=(B,),
            in_specs=[
                pl.BlockSpec((None, C, S), lambda b: (b, 0, 0)),   # batch dim squeezed
                pl.BlockSpec((C, Cr), lambda b: (0, 0)),
                pl.BlockSpec((C, Cr), lambda b: (0, 0)),
            ],
            out_specs=pl.BlockSpec((None, C, S), lambda b: (b, 0, 0)),
            compiler_params=cparams(("parallel",)),
            cost_estimate=elemwise_cost,
        )(xf, w1t, w2)
        return out.reshape(B, C, H, W)

    # ---- two-pass fallback: image larger than the per-block VMEM budget ----
    # TODO(synk): on v7x with B == 1 the pooling pass runs on a single
    # TensorCore; a spatial split of pass 1 plus a tiny cross-core combine of
    # the partial sums could shard its HBM read across both cores.

    S_pad = S
    if S % 128 != 0:
        # Pad the spatial dim to the next lane multiple so the tiled path keeps
        # lane-dense, unmasked stores and a bounded, pipelined block size.
        # Zero padding does not perturb the pooling sum (the divisor stays the
        # true S), and the pad is sliced off after pass 2.
        S_pad = ((S + 127) // 128) * 128
        xf = jnp.pad(xf, ((0, 0), (0, 0), (0, S_pad - S)))

    # ---- pass 1: spatial reduction -> tiny channel MLP -> scale (B, C, 1) ----
    st_a = _pick_spatial_tile(C, S_pad, itemsize, bufs=2,
                              budget_bytes=block_budget_bytes)
    y = pl.pallas_call(
        functools.partial(_pool_mlp_kernel, inv_s=inv_s),
        out_shape=jax.ShapeDtypeStruct((B, C, 1), jnp.float32),
        grid=(B, S_pad // st_a),
        in_specs=[
            pl.BlockSpec((None, C, st_a), lambda b, t: (b, 0, t)),
            pl.BlockSpec((C, Cr), lambda b, t: (0, 0)),
            pl.BlockSpec((C, Cr), lambda b, t: (0, 0)),
        ],
        out_specs=pl.BlockSpec((None, C, 1), lambda b, t: (b, 0, 0)),
        scratch_shapes=[pltpu.VMEM((C, 1), jnp.float32)],
        compiler_params=cparams(("parallel", "arbitrary")),
        cost_estimate=pl.CostEstimate(
            flops=B * C * S_pad + 4 * B * C * Cr,
            transcendentals=B * C,
            bytes_accessed=B * C * S_pad * itemsize + B * C * 4 + 2 * C * Cr * 4),
    )(xf, w1t, w2)

    # ---- pass 2: elementwise per-channel scaling (fully parallel) ----
    st_b = _pick_spatial_tile(C, S_pad, itemsize, bufs=4,
                              budget_bytes=block_budget_bytes)
    out = pl.pallas_call(
        _scale_kernel,
        out_shape=jax.ShapeDtypeStruct((B, C, S_pad), x.dtype),
        grid=(B, S_pad // st_b),
        in_specs=[
            pl.BlockSpec((None, C, st_b), lambda b, t: (b, 0, t)),
            pl.BlockSpec((None, C, 1), lambda b, t: (b, 0, 0)),
        ],
        out_specs=pl.BlockSpec((None, C, st_b), lambda b, t: (b, 0, t)),
        compiler_params=cparams(("parallel", "parallel")),
        cost_estimate=elemwise_cost,
    )(xf, y)
    if S_pad != S:
        out = out[:, :, :S]
    return out.reshape(B, C, H, W)


# ----------------- pure-JAX reference -----------------

def _ca_layer_reference(x, w1, w2):
    y = jnp.mean(x, axis=(2, 3), keepdims=True)            # (B, C, 1, 1)
    y = jnp.einsum("oc,bcij->boij", w1, y)                  # 1x1 conv, no bias
    y = jnp.maximum(y, 0.0)
    y = jnp.einsum("oc,bcij->boij", w2, y)
    y = 1.0 / (1.0 + jnp.exp(-y))
    return x * y


if __name__ == "__main__":
    key = jax.random.PRNGKey(0)
    kx, k1, k2, kx2 = jax.random.split(key, 4)

    # channel must be >= reduction (default 16) so conv_du has >= 1 hidden channel.
    B, C, H, W = 2, 32, 16, 16
    reduction = 16
    Cr = C // reduction

    x = jax.random.normal(kx, (B, C, H, W), dtype=jnp.float32)
    w1 = jax.random.normal(k1, (Cr, C), dtype=jnp.float32) * 0.1
    w2 = jax.random.normal(k2, (C, Cr), dtype=jnp.float32) * 0.1

    ref = _ca_layer_reference(x, w1, w2)

    # Fused single-pass path (default at this size).
    out_fused = jax.block_until_ready(ca_layer(x, w1, w2, allow_fused=True))
    assert out_fused.shape == (B, C, H, W), out_fused.shape
    assert jnp.allclose(out_fused, ref, atol=1e-5, rtol=1e-5), "fused path mismatch"

    # Tiled two-pass path, tiny budget forces multi-tile accumulation.
    out_tiled = jax.block_until_ready(
        ca_layer(x, w1, w2, allow_fused=False, block_budget_bytes=32 * 1024))
    assert jnp.allclose(out_tiled, ref, atol=1e-5, rtol=1e-5), "tiled path mismatch"

    # Non-128-multiple spatial size exercises the zero-padded tiled path.
    Hs, Ws = 15, 15
    xs = jax.random.normal(kx2, (B, C, Hs, Ws), dtype=jnp.float32)
    refs = _ca_layer_reference(xs, w1, w2)
    out_pad = jax.block_until_ready(
        ca_layer(xs, w1, w2, allow_fused=False, block_budget_bytes=32 * 1024))
    assert out_pad.shape == (B, C, Hs, Ws), out_pad.shape
    assert jnp.allclose(out_pad, refs, atol=1e-5, rtol=1e-5), "padded path mismatch"

    print("KERNEL_OK")
</pallas_src>

<mosaic_0001>
module attributes {stable_mosaic.version = 11 : i64} {
  func.func @_ca_fused_kernel(%arg0: i32, %arg1: memref<1x32x256xf32, #tpu.memory_space<vmem>>, %arg2: memref<32x2xf32, #tpu.memory_space<vmem>>, %arg3: memref<32x2xf32, #tpu.memory_space<vmem>>, %arg4: memref<1x32x256xf32, #tpu.memory_space<vmem>>) attributes {dimension_semantics = [#tpu.dimension_semantics<parallel>], iteration_bounds = array<i64: 2>, scalar_prefetch = 0 : i64, scratch_operands = 0 : i64, tpu.core_type = #tpu.core_type<tc>, window_params = [{transform_indices = @transform_0, window_bounds = array<i64: 1, 32, 256>}, {pipeline_mode = #tpu.pipeline_mode<synchronous>, transform_indices = @transform_1, window_bounds = array<i64: 32, 2>}, {pipeline_mode = #tpu.pipeline_mode<synchronous>, transform_indices = @transform_2, window_bounds = array<i64: 32, 2>}, {transform_indices = @transform_3, window_bounds = array<i64: 1, 32, 256>}]} {
    %c0 = arith.constant 0 : index
    %c0_0 = arith.constant 0 : index
    %c0_1 = arith.constant 0 : index
    %0 = vector.load %arg1[%c0, %c0_0, %c0_1] : memref<1x32x256xf32, #tpu.memory_space<vmem>>, vector<1x32x256xf32>
    %1 = vector.shape_cast %0 : vector<1x32x256xf32> to vector<32x256xf32>
    %cst = arith.constant dense<0.000000e+00> : vector<32xf32>
    %2 = vector.multi_reduction <add>, %1, %cst [1] : vector<32x256xf32> to vector<32xf32>
    %3 = vector.shape_cast %2 : vector<32xf32> to vector<32x1xf32>
    %cst_2 = arith.constant 3.906250e-03 : f32
    %4 = vector.broadcast %cst_2 : f32 to vector<32x1xf32>
    %5 = arith.mulf %3, %4 : vector<32x1xf32>
    %c0_3 = arith.constant 0 : index
    %c0_4 = arith.constant 0 : index
    %6 = vector.load %arg2[%c0_3, %c0_4] : memref<32x2xf32, #tpu.memory_space<vmem>>, vector<32x2xf32>
    %c0_5 = arith.constant 0 : index
    %c0_6 = arith.constant 0 : index
    %7 = vector.load %arg3[%c0_5, %c0_6] : memref<32x2xf32, #tpu.memory_space<vmem>>, vector<32x2xf32>
    %8 = vector.broadcast %5 : vector<32x1xf32> to vector<32x2xf32>
    %9 = arith.mulf %6, %8 : vector<32x2xf32>
    %cst_7 = arith.constant dense<0.000000e+00> : vector<2xf32>
    %10 = vector.multi_reduction <add>, %9, %cst_7 [0] : vector<32x2xf32> to vector<2xf32>
    %11 = vector.shape_cast %10 : vector<2xf32> to vector<1x2xf32>
    %cst_8 = arith.constant 0.000000e+00 : f32
    %12 = vector.broadcast %cst_8 : f32 to vector<1x2xf32>
    %13 = arith.maximumf %11, %12 : vector<1x2xf32>
    %14 = vector.broadcast %13 : vector<1x2xf32> to vector<32x2xf32>
    %15 = arith.mulf %7, %14 : vector<32x2xf32>
    %cst_9 = arith.constant dense<0.000000e+00> : vector<32xf32>
    %16 = vector.multi_reduction <add>, %15, %cst_9 [1] : vector<32x2xf32> to vector<32xf32>
    %17 = vector.shape_cast %16 : vector<32xf32> to vector<32x1xf32>
    %cst_10 = arith.constant 0.000000e+00 : f32
    %18 = vector.broadcast %cst_10 : f32 to vector<32x1xf32>
    %19 = arith.subf %18, %17 : vector<32x1xf32>
    %20 = math.exp %19 : vector<32x1xf32>
    %cst_11 = arith.constant 1.000000e+00 : f32
    %21 = vector.broadcast %cst_11 : f32 to vector<32x1xf32>
    %22 = arith.addf %21, %20 : vector<32x1xf32>
    %cst_12 = arith.constant 1.000000e+00 : f32
    %23 = vector.broadcast %cst_12 : f32 to vector<32x1xf32>
    %24 = arith.divf %23, %22 : vector<32x1xf32>
    %25 = vector.broadcast %24 : vector<32x1xf32> to vector<32x256xf32>
    %26 = arith.mulf %1, %25 : vector<32x256xf32>
    %c0_13 = arith.constant 0 : index
    %c0_14 = arith.constant 0 : index
    %c0_15 = arith.constant 0 : index
    %27 = vector.load %arg4[%c0_13, %c0_14, %c0_15] : memref<1x32x256xf32, #tpu.memory_space<vmem>>, vector<1x32x256xf32>
    %28 = vector.shape_cast %27 : vector<1x32x256xf32> to vector<32x256xf32>
    %29 = vector.shape_cast %26 : vector<32x256xf32> to vector<1x32x256xf32>
    tpu.vector_store %arg4[%c0_13, %c0_14, %c0_15], %29 {strides = array<i32>} : memref<1x32x256xf32, #tpu.memory_space<vmem>>, vector<1x32x256xf32>,
    return
  }
  func.func @transform_0(%arg0: i32) -> (i32, i32, i32) {
    %c0_i32 = arith.constant 0 : i32
    %c0_i32_0 = arith.constant 0 : i32
    %c0_i32_1 = arith.constant 0 : i32
    return %arg0, %c0_i32, %c0_i32_0 : i32, i32, i32
  }
  func.func @transform_1(%arg0: i32) -> (i32, i32) {
    %c0_i32 = arith.constant 0 : i32
    %c0_i32_0 = arith.constant 0 : i32
    %c0_i32_1 = arith.constant 0 : i32
    return %c0_i32, %c0_i32_0 : i32, i32
  }
  func.func @transform_2(%arg0: i32) -> (i32, i32) {
    %c0_i32 = arith.constant 0 : i32
    %c0_i32_0 = arith.constant 0 : i32
    %c0_i32_1 = arith.constant 0 : i32
    return %c0_i32, %c0_i32_0 : i32, i32
  }
  func.func @transform_3(%arg0: i32) -> (i32, i32, i32) {
    %c0_i32 = arith.constant 0 : i32
    %c0_i32_0 = arith.constant 0 : i32
    %c0_i32_1 = arith.constant 0 : i32
    return %arg0, %c0_i32, %c0_i32_0 : i32, i32, i32
  }
}

</mosaic_0001>

<bundles_post_ra>
// kernel: tpu_custom_call.1
= control target key start
LH: loop header
LB: loop body
LE: loop exit
PB: predicated region body
PF: predicated region fallthrough
CT: control target
= control target key end

     0   :  { %8 = vsyncpa [#allocation3], 0  ;;  %s819_s0 = inlined_call_operand.hbm [shape: f32[2,32,256], index: 0, kind: input, shape index: {}]   ;;  %s820_s1 = inlined_call_operand.vmem [shape: f32[32,2], index: 1, kind: input, shape index: {}]   ;;  %s821_s2 = inlined_call_operand.vmem [shape: f32[32,2], index: 2, kind: input, shape index: {}]   ;;  %s822_s3 = inlined_call_operand.hbm [shape: f32[2,32,256], index: 3, kind: output, shape index: {}]  }
   0x1   :  { %10 = vsyncpa [#allocation3 + $0x1], 0 }
   0x2   :  { %11 = vsyncpa [#allocation4], 0 }
   0x3   :  { %13 = vsyncpa [#allocation4 + $0x1], 0  ;;  %s589_s12 = smov 0   ;;  %s591_s13 = smov 0  }
   0x4   :  { %s593_s14 = smov 0   ;;  %s595_s15 = smov 0  }
   0x5 LB: > { %s610_s16 = sadd.s32 4294967295, %s561_s15   ;;  %s383_s17 = sadd.s32 4294967294, %s561_s15   ;;  %s561_s15 = sphi %s595_s15, %s835_s15   ;;  %s557_s14 = sphi %s593_s14, %s834_s14   ;;  %s553_s13 = sphi %s591_s13, %s833_s13   ;;  %s549_s12 = sphi %s589_s12, %s832_s12  }
   0x6   : > { %s614_s18 = sadd.s32 1, %s561_s15   ;;  %s26_s19 = sadd.s32 1, %s557_s14 }
   0x7   : > { %s23_s20 = ssub.s32 %s561_s15, %s614_s18  ;;  %p33_p0 = scmp.ne.s32.totalorder %s557_s14, %s553_s13 }
   0x8   : > { %p24_p1 = scmp.eq.s32.totalorder %s23_s20, 0  ;;  %p34_p2 = scmp.eq.s32.totalorder %s561_s15, 0 }
   0x9   : > { %p39_p3 = scmp.ne.s32.totalorder %s553_s13, %s549_s12  ;;  %p40_p4 = scmp.eq.s32.totalorder %s610_s16, 0 }
   0xa   : > { %s626_s21 = scalar_select %p24_p1, %s557_s14, %s26_s19  }
   0xb   : > { %p628_p5 = por %p34_p2, %p33_p0  ;;  %p632_p6 = por %p40_p4, %p39_p3 }
   0xc   : > { %p105_p7 = scmp.eq.s32.totalorder %s610_s16, 1  ;;  %p111_p8 = scmp.eq.s32.totalorder %s383_s17, 1 }
   0xd   : > { %p411_p10 = scmp.lt.s32.totalorder %s561_s15, 2  ;;  %s137_s26 = sand.u32 1, %s557_s14  }
   0xe   : > { %p639_p11 = por %p105_p7, %p33_p0  ;;  %p643_p12 = por %p111_p8, %p39_p3 }
   0xf   : > { %s397_s27 = sshll.u32 %s561_s15, 10  ;;  %s386_s28 = sshll.u32 %s137_s26, 6 }
  0x10   : > { %s826_s24 = scalar_select %p639_p11, 1, 0 }
  0x11   : > { %s827_s25 = scalar_select %p643_p12, 1, 0 }
  0x12   : > { %s652_s4 = scalar_lea.hbm %s819_s0, %s397_s27  ;;  %s141_s5 = scalar_lea.vmem [#allocation2], %s386_s28 }
  0x13   : > { %s148_s6 = sshll.u32 %s141_s5, 4  ;;  %p656_p13 = pnand %p411_p10, %p628_p5  ;;  %s660_s6 = int_to_ptr.vmem [resolvable:$true] %s148_s6 }
  0x14   : > { %s662_s8 = scalar_lea.sflag [#allocation3], %s137_s26  ;;  %s465_s9 = scalar_lea.hbm %s652_s4, 1024 }
  0x15   : > { %p466_p0 = scmp.ne.s32.totalorder %s652_s4, %s465_s9  ;;  %p467_p1 = pneg %p656_p13 }
  0x16   : > { %s470_s17 = scalar_lea.hbm %s819_s0, 2048  ;;  %p471_p4 = scmp.lt.u32.totalorder %s652_s4, %s819_s0 }
  0x17   : > { %p468_p2 = pnand %p467_p1, %p466_p0  ;;  %p472_p5 = scmp.lt.u32.totalorder %s470_s17, %s465_s9 }
  0x18   : > { %p474_p8 = scmp.lt.u32.totalorder %s465_s9, %s652_s4 }
  0x19   : > { %p469_p3 = pneg %p468_p2  ;;  %p473_p7 = por %p472_p5, %p471_p4 }
  0x1b   : > { %p475_p10 = por %p474_p8, %p473_p7 }
  0x1d   : > { %p476_p9 = pnand %p475_p10, %p469_p3 }
  0x1f   : > { %479 = shalt.err (!%p476_p9)
}
  0x20   : > { %s480_s22 = scalar_lea.vmem %s660_s6, 1024  ;;  %s563_s26 = smov [#allocation2]  }
  0x21   : > { %p481_p0 = scmp.ne.s32.totalorder %s660_s6, %s480_s22  ;;  %s485_s27 = sshll.u32 %s563_s26, 4  ;;  %s486_s27 = int_to_ptr.vmem [resolvable:$false] %s485_s27 }
  0x22   : > { %s487_s28 = scalar_lea.vmem %s486_s27, 2048  ;;  %p488_p11 = scmp.lt.s32.totalorder %s660_s6, %s486_s27 }
  0x23   : > { %p483_p2 = pnand %p481_p0, %p467_p1  ;;  %p489_p4 = scmp.lt.s32.totalorder %s487_s28, %s480_s22 }
  0x25   : > { %p484_p12 = pneg %p483_p2  ;;  %p490_p5 = por %p489_p4, %p488_p11 }
  0x27   : > { %p491_p7 = pnand %p490_p5, %p484_p12 }
  0x29   : > { %494 = shalt.err (!%p491_p7)
}
  0x2a   : > { %s564_s29 = smov 256   ;;  %s565_s30 = smov 16  }
  0x2b   : > { %406 = dma.hbm_to_vmem [thread:$0]  (!%p656_p13), %s652_s4, 1024, %s660_s6, %s662_s8, %s564_s29, %s564_s29, %s565_s30  }
  0x2c   : > { %p389_p9 = scmp.ge.s32.totalorder %s561_s15, 1  ;;  %p156_p1 = scmp.lt.s32.totalorder %s561_s15, 3 }
  0x2e   : > { %p157_p3 = pnand %p389_p9, %p156_p1 }
  0x2f   : > { %s693_s5 = sand.u32 (!%p157_p3), 1, %s553_s13  }
  0x30   : > { %160 = sbr.rel (%p157_p3) target bundleno = 425 (0x1a9), region = 32  ;;  %s390_s9 = sshll.u32 (!%p157_p3), %s693_s5, 6 }
  0x31   : > { %s163_s10 = scalar_lea.sflag (!%p157_p3), [#allocation3], %s693_s5  ;;  %s166_s11 = scalar_lea.vmem (!%p157_p3), [#allocation2], %s390_s9 }
  0x37   : > { %540 = dma.done.wait (%p632_p6), %s163_s10, 1024  }
  0x38   : > { %542 = vsyncadd (%p632_p6), %s163_s10, 4294966272  ;;  %v703_v0 = vld [vmem:[%s166_s11] sm:$0xff]  ;;  %v705_v1 = vld [vmem:[%s166_s11 + $0x8] sm:$0xff]  ;;  %vm225_vm0 = vcmask 15360   ;;  %s398_s23 = sshll.u32 %s610_s16, 10  ;;  %s188_s4 = scalar_lea.vmem [#allocation5], %s390_s9 }
  0x39   : > { %v707_v2 = vld [vmem:[%s166_s11 + $0x20] sm:$0xff]  ;;  %v197_v3 = vadd.f32 %v705_v1, %v703_v0  ;;  %v711_v4 = vld [vmem:[%s166_s11 + $0x28] sm:$0xff]  ;;  %v713_v5 = vld [vmem:[%s166_s11 + $0x10] sm:$0xff]  ;;  %s310_s6 = sshll.u32 %s188_s4, 4  ;;  %s771_s17 = scalar_lea.hbm %s822_s3, %s398_s23  ;;  %s773_s6 = int_to_ptr.vmem [resolvable:$true] %s310_s6 }
  0x3a   : > { %v715_v6 = vld [vmem:[%s166_s11 + $0x18] sm:$0xff]  ;;  %v203_v7 = vadd.f32 %v711_v4, %v707_v2  ;;  %v719_v8 = vld [vmem:[%s166_s11 + $0x30] sm:$0xff]  ;;  %v213_v15 = vld [vmem:[%s820_s1] sm:$0xff]  ;;  %s297_s16 = scalar_lea.sflag [#allocation4], %s693_s5  ;;  %s495_s9 = scalar_lea.vmem %s773_s6, 1024 }
  0x3b   : > { %v721_v9 = vld [vmem:[%s166_s11 + $0x38] sm:$0xff]  ;;  %198 = vadd.xlane.f32.xlu0 %v197_v3  ;;  %v200_v10 = vadd.f32 %v715_v6, %v713_v5  ;;  %v215_v17 = vld [vmem:[%s820_s1 + $0x10] sm:$0xff]  ;;  %v214_v18 = vld [vmem:[%s820_s1 + $0x8] sm:$0xff]  ;;  %p496_p6 = scmp.ne.s32.totalorder %s773_s6, %s495_s9  ;;  %p829_p11 = scmp.ne.s32.totalorder %s826_s24, 0 }
  0x3c   : > { %204 = vadd.xlane.f32.xlu1 %v203_v7  ;;  %v206_v11 = vadd.f32 %v721_v9, %v719_v8  ;;  %v216_v22 = vld [vmem:[%s820_s1 + $0x18] sm:$0xff]  ;;  %v218_v41 = vld [vmem:[%s821_s2 + $0x8] sm:$0xff]  ;;  %v217_v42 = vld [vmem:[%s821_s2] sm:$0xff]  ;;  %s566_s19 = smov [#allocation5]  }
  0x3d   : > { %v220_v44 = vld [vmem:[%s821_s2 + $0x18] sm:$0xff]  ;;  %v219_v45 = vld [vmem:[%s821_s2 + $0x10] sm:$0xff]  ;;  %p497_p12 = pnand %p496_p6, %p829_p11  ;;  %s499_s20 = sshll.u32 %s566_s19, 4  ;;  %s500_s20 = int_to_ptr.vmem [resolvable:$false] %s499_s20 }
  0x3e   : > { %s501_s22 = scalar_lea.vmem %s500_s20, 2048  ;;  %p502_p8 = scmp.lt.s32.totalorder %s773_s6, %s500_s20 }
  0x3f   : > { %201 = vadd.xlane.f32.xlu0 %v200_v10  ;;  %p498_p13 = pneg %p497_p12  ;;  %p503_p10 = scmp.lt.s32.totalorder %s501_s22, %s495_s9 }
  0x40   : > { %207 = vadd.xlane.f32.xlu1 %v206_v11 }
  0x41   : > { %p504_p0 = por %p503_p10, %p502_p8 }
  0x43   : > { %p505_p2 = pnand %p504_p0, %p498_p13 }
  0xc8   : > { %v199_v12 = vpop.xlane.xlu0 %198 }
  0xc9   : > { %v209_v13 = vmul.f32 0.00390625, %v199_v12  ;;  %v205_v14 = vpop.xlane.xlu1 %204 }
  0xca   : > { %v211_v16 = vmul.f32 0.00390625, %v205_v14 }
  0xcb   : > { %v221_v20 = vmul.f32 %v213_v15, %v209_v13 }
  0xcc   : > { %v202_v19 = vpop.xlane.xlu0 %201  ;;  %v223_v25 = vmul.f32 %v215_v17, %v211_v16 }
  0xcd   : > { %v210_v21 = vmul.f32 0.00390625, %v202_v19  ;;  %v208_v23 = vpop.xlane.xlu1 %207  ;;  %v226_v28 = vsel %vm225_vm0, %v221_v20, 0.0 }
  0xce   : > { %v212_v24 = vmul.f32 0.00390625, %v208_v23  ;;  %v229_v31 = vsel %vm225_vm0, %v223_v25, 0.0 }
  0xcf   : > { %v222_v26 = vmul.f32 %v214_v18, %v210_v21 }
  0xd0   : > { %v224_v27 = vmul.f32 %v216_v22, %v212_v24 }
  0xd1   : > { %v227_v29 = vsel %vm225_vm0, %v222_v26, 0.0 }
  0xd2   : > { %v228_v30 = vadd.f32 %v227_v29, %v226_v28  ;;  %v231_v32 = vsel %vm225_vm0, %v224_v27, 0.0 }
  0xd4   : > { %v230_v33 = vadd.f32 %v229_v31, %v228_v30 }
  0xd6   : > { %v232_v34 = vadd.f32 %v231_v32, %v230_v33 }
  0xd8   : > { %v233_v35 = vrot.slane %v232_v34, 4 }
  0xda   : > { %v234_v36 = vadd.f32 %v233_v35, %v232_v34 }
  0xdc   : > { %v235_v37 = vrot.slane %v234_v36, 2 }
  0xde   : > { %v236_v38 = vadd.f32 %v235_v37, %v234_v36 }
  0xe0   : > { %v237_v39 = vrot.slane %v236_v38, 1 }
  0xe2   : > { %v238_v40 = vadd.f32 %v237_v39, %v236_v38 }
  0xe4   : > { %v239_v43 = vmax.f32 %v238_v40, 0.0 }
  0xe6   : > { %v241_v46 = vmul.f32 %v239_v43, %v218_v41  ;;  %v240_v47 = vmul.f32 %v239_v43, %v217_v42  ;;  %v243_v50 = vmul.f32 %v239_v43, %v220_v44  ;;  %v242_v51 = vmul.f32 %v239_v43, %v219_v45 }
  0xe8   : > { %v247_v48 = vsel %vm225_vm0, %v241_v46, 0.0  ;;  %v244_v49 = vsel %vm225_vm0, %v240_v47, 0.0  ;;  %v253_v52 = vsel %vm225_vm0, %v243_v50, 0.0  ;;  %v250_v53 = vsel %vm225_vm0, %v242_v51, 0.0 }
  0xe9   : > { %248 = vadd.xlane.f32.xlu1 %v247_v48  ;;  %245 = vadd.xlane.f32.xlu0 %v244_v49 }
  0xed   : > { %254 = vadd.xlane.f32.xlu1 %v253_v52  ;;  %251 = vadd.xlane.f32.xlu0 %v250_v53 }
 0x176   : > { %v249_v54 = vpop.xlane.xlu1 %248  ;;  %v246_v55 = vpop.xlane.xlu0 %245 }
 0x177   : > { %v257_v56 = vsub.f32 0.0, %v249_v54  ;;  %v256_v57 = vsub.f32 0.0, %v246_v55 }
 0x179   : > { %v262_v58 = vmul.f32 1.442695, %v257_v56  ;;  %v260_v59 = vmul.f32 1.442695, %v256_v57 }
 0x17a   : > { %v255_v60 = vpop.xlane.xlu1 %254  ;;  %v252_v61 = vpop.xlane.xlu0 %251 }
 0x17b   : > { %449 = vpow2.f32 %v262_v58  ;;  %v259_v62 = vsub.f32 0.0, %v255_v60  ;;  %v258_v63 = vsub.f32 0.0, %v252_v61 }
 0x17c   : > { %451 = vpow2.f32 %v260_v59 }
 0x17d   : > { %v266_v3 = vmul.f32 1.442695, %v259_v62  ;;  %v264_v7 = vmul.f32 1.442695, %v258_v63 }
 0x17f   : > { %453 = vpow2.f32 %v266_v3 }
 0x180   : > { %455 = vpow2.f32 %v264_v7 }
 0x185   : > { %v450_v10 = vpop.eup %449 }
 0x186   : > { %v452_v11 = vpop.eup %451  ;;  %v269_v12 = vadd.f32 1.0, %v450_v10 }
 0x187   : > { %v268_v13 = vadd.f32 1.0, %v452_v11 }
 0x188   : > { %457 = vrcp.f32 %v269_v12 }
 0x189   : > { %v454_v14 = vpop.eup %453  ;;  %459 = vrcp.f32 %v268_v13 }
 0x18a   : > { %v456_v15 = vpop.eup %455  ;;  %v271_v16 = vadd.f32 1.0, %v454_v14 }
 0x18b   : > { %v270_v17 = vadd.f32 1.0, %v456_v15 }
 0x18c   : > { %461 = vrcp.f32 %v271_v16 }
 0x18d   : > { %463 = vrcp.f32 %v270_v17 }
 0x192   : > { %v458_v18 = vpop.eup %457 }
 0x193   : > { %v460_v19 = vpop.eup %459  ;;  %v282_v20 = vmul.f32 %v458_v18, %v713_v5  ;;  %v283_v21 = vmul.f32 %v458_v18, %v715_v6 }
 0x194   : > { %v280_v22 = vmul.f32 %v460_v19, %v703_v0  ;;  %v281_v23 = vmul.f32 %v460_v19, %v705_v1 }
 0x195   : > { %290 = vst [vmem:[%s188_s4 + $0x10] sm:$0xff] %v282_v20  ;;  %291 = vst [vmem:[%s188_s4 + $0x18] sm:$0xff] %v283_v21 }
 0x196   : > { %v462_v24 = vpop.eup %461  ;;  %288 = vst [vmem:[%s188_s4] sm:$0xff] %v280_v22  ;;  %289 = vst [vmem:[%s188_s4 + $0x8] sm:$0xff] %v281_v23 }
 0x197   : > { %v464_v25 = vpop.eup %463  ;;  %v286_v5 = vmul.f32 %v462_v24, %v719_v8  ;;  %v287_v6 = vmul.f32 %v462_v24, %v721_v9 }
 0x198   : > { %v284_v0 = vmul.f32 %v464_v25, %v707_v2  ;;  %v285_v1 = vmul.f32 %v464_v25, %v711_v4 }
 0x199   : > { %294 = vst [vmem:[%s188_s4 + $0x30] sm:$0xff] %v286_v5  ;;  %295 = vst [vmem:[%s188_s4 + $0x38] sm:$0xff] %v287_v6 }
 0x19a   : > { %292 = vst [vmem:[%s188_s4 + $0x20] sm:$0xff] %v284_v0  ;;  %293 = vst [vmem:[%s188_s4 + $0x28] sm:$0xff] %v285_v1 }
 0x19b   : > { %508 = shalt.err (!%p505_p2)
}
 0x19c   : > { %s509_s26 = scalar_lea.hbm %s771_s17, 1024  ;;  %s513_s29 = scalar_lea.hbm %s822_s3, 2048 }
 0x19d   : > { %p510_p4 = scmp.ne.s32.totalorder %s771_s17, %s509_s26  ;;  %p514_p9 = scmp.lt.u32.totalorder %s771_s17, %s822_s3 }
 0x19e   : > { %p515_p1 = scmp.lt.u32.totalorder %s513_s29, %s509_s26  ;;  %p517_p6 = scmp.lt.u32.totalorder %s509_s26, %s771_s17 }
 0x19f   : > { %p511_p5 = pnand %p510_p4, %p829_p11 }
 0x1a0   : > { %p516_p3 = por %p515_p1, %p514_p9 }
 0x1a1   : > { %p512_p7 = pneg %p511_p5 }
 0x1a2   : > { %p518_p12 = por %p517_p6, %p516_p3 }
 0x1a4   : > { %p519_p13 = pnand %p518_p12, %p512_p7 }
 0x1a6   : > { %522 = shalt.err (!%p519_p13)
}
 0x1a7   : > { %s567_s11 = smov 256   ;;  %s568_s23 = smov 16  }
 0x1a8   : > { %401 = dma.vmem_to_hbm [thread:$0]  (%p829_p11), %s773_s6, 1024, %s771_s17, %s297_s16, %s567_s11, %s567_s11, %s568_s23  }
 0x1a9 PF: > { %s325_s4 = sand.u32 1, %s549_s12   ;;  %p830_p8 = scmp.ne.s32.totalorder %s827_s25, 0 }
 0x1aa   : > { %p831_p10 = scmp.ge.s32.totalorder %s561_s15, 2  ;;  %s326_s7 = scalar_lea.sflag [#allocation4], %s325_s4 }
 0x1ac   : > { %p408_p0 = pnand %p831_p10, %p830_p8 }
 0x1ae   : > { %544 = dma.done.wait (!%p408_p0), %s326_s7, 1024  }
 0x1af   : > { %546 = vsyncadd (!%p408_p0), %s326_s7, 4294966272  ;;  %p16_p2 = scmp.ge.s32.totalorder %s614_s18, 4   ;;  %s832_s12 = smov %s553_s13 }
 0x1b0   : > { %s833_s13 = smov %s557_s14  ;;  %s834_s14 = smov %s626_s21 }
 0x1b1   : > { %s835_s15 = smov %s614_s18  ;;  %18 = sbr.rel (!%p16_p2) target bundleno = 5 (0x5), region = 77 }
 0x1b8   :  { %331 = vsyncpa [#allocation3], 1 }
 0x1b9   :  { %333 = vsyncpa [#allocation3 + $0x1], 1 }
 0x1ba   :  { %334 = vsyncpa [#allocation4], 1 }
 0x1bb   :  { %336 = vsyncpa [#allocation4 + $0x1], 1 }

</bundles_post_ra>
